<compile_context>
chip_gen: v7x
topology: tpu7x:2x2x1
jax: 0.10.0
libtpu: 0.0.40
codegen_flags: <defaults>
</compile_context>

<pallas_src>
import math
from functools import partial

import jax
import jax.numpy as jnp
from jax.experimental import pallas as pl
from jax.experimental.pallas import tpu as pltpu


def attention_kernel(x_ref, w_ref, b_ref, o_ref, acc_ref, den_ref, *,
                     use_mxu, seq_len):
    s = pl.program_id(1)

    @pl.when(s == 0)
    def _():
        acc_ref[...] = jnp.zeros_like(acc_ref)
        den_ref[...] = jnp.zeros_like(den_ref)

    x = x_ref[...]                                   # (TB, TS, D) native dtype
    TB, TS, D = x.shape
    b = b_ref[0]                                     # f32 scalar from SMEM

    if use_mxu:
        # Lane-replicated weight (D, D): one MXU pass per x vreg; every output
        # lane already holds the score, so tanh/exp and the `a` multiply need
        # no lane-broadcast / keepdims relayout.
        scores = jnp.dot(x.reshape(TB * TS, D), w_ref[...],
                         preferred_element_type=jnp.float32) + b
        a = jnp.exp(jnp.tanh(scores)).reshape(TB, TS, D)       # f32, replicated
    else:
        # VPU multiply + lane (XLU) reduce; keepdims keeps the later broadcast
        # over D cheap.  exp needs no max-subtraction because tanh bounds the
        # scores to [-1, 1] (matches the PyTorch reference).
        w = w_ref[...]                               # (1, D) lane-dense
        scores = jnp.sum(x * w[None, :, :], axis=-1, keepdims=True,
                         dtype=jnp.float32) + b      # (TB, TS, 1) f32
        a = jnp.exp(jnp.tanh(scores))                # (TB, TS, 1) f32

    # Mask padded sequence positions of a partial trailing S block.  Padded
    # *batch* rows need no masking: all reductions are per batch row and the
    # out-of-range output rows are clipped on writeback.
    mask_tail = (seq_len % TS) != 0
    if mask_tail:
        pos = s * TS + jax.lax.broadcasted_iota(jnp.int32, (TS, 1), 0)
        valid = (pos < seq_len)[None, :, :]          # (1, TS, 1)
        a = jnp.where(valid, a, 0.0)

    # Keep `a` and the product in f32 for parity with the f32 reference.
    wx = x.astype(jnp.float32) * a                   # (TB, TS, D) f32
    if mask_tail:
        wx = jnp.where(valid, wx, 0.0)               # kill NaN/Inf from padding

    acc_ref[...] += jnp.sum(wx, axis=1)              # (TB, D)  f32
    den_ref[...] += jnp.sum(a, axis=1)               # (TB, D|1) f32

    @pl.when(s == pl.num_programs(1) - 1)
    def _():
        # Exact divide (the approx EUP reciprocal caused the ~2e-3 mismatch).
        o_ref[...] = (acc_ref[...] / (den_ref[...] + 1e-10)).astype(o_ref.dtype)


def _round_down_mult(x, m):
    return max(m, (x // m) * m)


def _choose_tiles(B, S, D, itemsize, target_bytes=4 << 20):
    """Pick (TB, TS).

    TB: multiple of 8 (or == B); at least 2 grid steps when B >= 16 so the
    'parallel' axis can shard across v7x's two TensorCores, preferring an even
    step count and TB | B.
    TS: multiple of 8 (or == S); only split S when the full (TB, S, D) tile
    would exceed ~2x the ~4 MiB target tile.
    """
    row_bytes = max(1, S * D * itemsize)
    if B <= 8:
        TB = B
    else:
        tb_cap = _round_down_mult(B // 2, 8) if B >= 16 else _round_down_mult(B, 8)
        tb_budget = _round_down_mult(max(8, target_bytes // row_bytes), 8)
        tb = max(8, min(tb_cap, tb_budget))
        TB = tb
        best = None
        for cand in range(tb, 7, -8):
            if B % cand == 0:
                if (B // cand) % 2 == 0:     # even step count -> balanced cores
                    best = cand
                    break
                if best is None:
                    best = cand
        if best is not None:
            TB = best

    if TB * S * D * itemsize <= 2 * target_bytes or S <= 8:
        TS = S
    else:
        ts = _round_down_mult(max(8, target_bytes // max(1, TB * D * itemsize)), 8)
        ts = min(ts, _round_down_mult(S, 8))
        TS = ts
        for cand in range(ts, 7, -8):
            if S % cand == 0:               # prefer a divisor (no tail masking)
                TS = cand
                break
    return TB, TS


def attention(x, W, b, *, batch_tile=None, seq_tile=None):
    B, S, D = x.shape
    itemsize = jnp.dtype(x.dtype).itemsize
    TB, TS = _choose_tiles(B, S, D, itemsize)
    if batch_tile is not None:
        TB = batch_tile
    if seq_tile is not None:
        TS = seq_tile

    # MXU score path: only for low-precision inputs (bf16 MXU is single-pass
    # and exact) with a lane-aligned, small D.
    use_mxu = (D % 128 == 0) and (D <= 256) and (x.dtype != jnp.float32)
    if use_mxu:
        w_in = jnp.broadcast_to(W.reshape(D, 1), (D, D)).astype(x.dtype)
        w_spec = pl.BlockSpec((D, D), lambda i, s: (0, 0))
        den_w = D
    else:
        w_in = W.reshape(1, D).astype(x.dtype)       # lane-dense weight row
        w_spec = pl.BlockSpec((1, D), lambda i, s: (0, 0))
        den_w = 1

    grid = (pl.cdiv(B, TB), pl.cdiv(S, TS))

    tile_bytes = TB * TS * D * itemsize
    # v7x has only 64 MiB physical VMEM (32 MiB scoped default): cap at 40 MiB,
    # leaving headroom for the f32 temporaries and Mosaic internal scratch.
    vmem_limit = int(min(40 << 20, max(16 << 20, 8 * tile_bytes + (2 << 20))))

    kernel = partial(attention_kernel, use_mxu=use_mxu, seq_len=S)

    return pl.pallas_call(
        kernel,
        out_shape=jax.ShapeDtypeStruct((B, D), x.dtype),
        grid_spec=pltpu.PrefetchScalarGridSpec(
            num_scalar_prefetch=0,
            grid=grid,
            in_specs=[
                pl.BlockSpec((TB, TS, D), lambda i, s: (i, s, 0)),
                w_spec,
                pl.BlockSpec(memory_space=pltpu.MemorySpace.SMEM),
            ],
            out_specs=pl.BlockSpec((TB, D), lambda i, s: (i, 0)),
            scratch_shapes=[
                pltpu.VMEM((TB, D), jnp.float32),      # weighted-sum accumulator
                pltpu.VMEM((TB, den_w), jnp.float32),  # softmax denominator
            ],
        ),
        compiler_params=pltpu.CompilerParams(
            dimension_semantics=("parallel", "arbitrary"),
            vmem_limit_bytes=vmem_limit,
        ),
    )(x, w_in, b.astype(jnp.float32))


def attention_ref(x, W, b):
    # torch.mm(x.view(-1,D), W).view(B,S) written as an exact f32 reduction so
    # the comparison is insensitive to XLA's default MXU matmul precision.
    eij = jnp.sum(x * W.reshape(1, 1, -1), axis=-1) + b[0]
    eij = jnp.tanh(eij)
    a = jnp.exp(eij)
    a = a / (jnp.sum(a, axis=1, keepdims=True) + 1e-10)
    return jnp.sum(x * a[..., None], axis=1)


def _make_inputs(key, B, S, D, x_dtype=jnp.float32):
    kx, kw = jax.random.split(key)
    x = jax.random.normal(kx, (B, S, D), dtype=jnp.float32).astype(x_dtype)
    # Deterministic kaiming_uniform_ equivalent for weight (D, 1): fan_in = 1
    # -> bound = sqrt(2) * sqrt(3 / 1) = sqrt(6)
    bound = math.sqrt(6.0)
    W = jax.random.uniform(kw, (D, 1), dtype=jnp.float32,
                           minval=-bound, maxval=bound)
    b = jnp.zeros((1,), dtype=jnp.float32)
    return x, W, b


def _run_case(key, B, S, D, batch_tile=None, seq_tile=None):
    x, W, b = _make_inputs(key, B, S, D)
    out = jax.block_until_ready(
        attention(x, W, b, batch_tile=batch_tile, seq_tile=seq_tile))
    ref = attention_ref(x, W, b)
    assert out.shape == (B, D)
    err = float(jnp.max(jnp.abs(out - ref)))
    assert jnp.allclose(out, ref, atol=1e-3, rtol=1e-3), err


def _run_case_bf16(key, B, S, D):
    x, W, b = _make_inputs(key, B, S, D, x_dtype=jnp.bfloat16)
    out = jax.block_until_ready(attention(x, W, b))
    # Reference in f32 on the same quantized values the kernel sees.
    ref = attention_ref(x.astype(jnp.float32),
                        W.astype(jnp.bfloat16).astype(jnp.float32), b)
    assert out.shape == (B, D)
    err = float(jnp.max(jnp.abs(out.astype(jnp.float32) - ref)))
    assert jnp.allclose(out.astype(jnp.float32), ref, atol=1e-2, rtol=2e-2), err


if __name__ == "__main__":
    key = jax.random.PRNGKey(0)
    k0, k1, k2, k3 = jax.random.split(key, 4)

    # Small shapes consistent with the module: (batch, seq, feature_dim).
    _run_case(k0, B=2, S=8, D=32)                    # VPU+XLU score path, tiny
    _run_case(k1, B=32, S=16, D=128)                 # 2-step 'parallel' batch grid
    _run_case(k2, B=8, S=40, D=128, seq_tile=16)     # S-split grid + tail mask
    _run_case_bf16(k3, B=16, S=24, D=128)            # MXU lane-replicated scores

    print("KERNEL_OK")
</pallas_src>

<mosaic_0001>
module attributes {stable_mosaic.version = 11 : i64} {
  func.func @attention_kernel(%arg0: i32, %arg1: i32, %arg2: memref<2x8x32xf32, #tpu.memory_space<vmem>>, %arg3: memref<1x32xf32, #tpu.memory_space<vmem>>, %arg4: memref<1xf32, #tpu.memory_space<smem>>, %arg5: memref<2x32xf32, #tpu.memory_space<vmem>>, %arg6: memref<2x32xf32, #tpu.memory_space<vmem>>, %arg7: memref<2x1xf32, #tpu.memory_space<vmem>>) attributes {dimension_semantics = [#tpu.dimension_semantics<parallel>, #tpu.dimension_semantics<arbitrary>], iteration_bounds = array<i64: 1, 1>, scalar_prefetch = 0 : i64, scratch_operands = 2 : i64, tpu.core_type = #tpu.core_type<tc>, window_params = [{transform_indices = @transform_0, window_bounds = array<i64: 2, 8, 32>}, {pipeline_mode = #tpu.pipeline_mode<synchronous>, transform_indices = @transform_1, window_bounds = array<i64: 1, 32>}, {transform_indices = @transform_2, window_bounds = array<i64: 1>}, {transform_indices = @transform_3, window_bounds = array<i64: 2, 32>}]} {
    %c0_i32 = arith.constant 0 : i32
    %0 = arith.cmpi eq, %arg1, %c0_i32 : i32
    %1 = arith.extui %0 : i1 to i32
    %c0_i32_0 = arith.constant 0 : i32
    %2 = arith.cmpi ne, %1, %c0_i32_0 : i32
    scf.if %2 {
      %cst_18 = arith.constant 0.000000e+00 : f32
      %28 = vector.broadcast %cst_18 : f32 to vector<2x32xf32>
      %c0_19 = arith.constant 0 : index
      %c0_20 = arith.constant 0 : index
      %29 = vector.load %arg6[%c0_19, %c0_20] : memref<2x32xf32, #tpu.memory_space<vmem>>, vector<2x32xf32>
      tpu.vector_store %arg6[%c0_19, %c0_20], %28 {strides = array<i32>} : memref<2x32xf32, #tpu.memory_space<vmem>>, vector<2x32xf32>,
      %cst_21 = arith.constant 0.000000e+00 : f32
      %30 = vector.broadcast %cst_21 : f32 to vector<2x1xf32>
      %c0_22 = arith.constant 0 : index
      %c0_23 = arith.constant 0 : index
      %31 = vector.load %arg7[%c0_22, %c0_23] : memref<2x1xf32, #tpu.memory_space<vmem>>, vector<2x1xf32>
      tpu.vector_store %arg7[%c0_22, %c0_23], %30 {strides = array<i32>} : memref<2x1xf32, #tpu.memory_space<vmem>>, vector<2x1xf32>,
    } else {
    }
    %c0 = arith.constant 0 : index
    %c0_1 = arith.constant 0 : index
    %c0_2 = arith.constant 0 : index
    %3 = vector.load %arg2[%c0, %c0_1, %c0_2] : memref<2x8x32xf32, #tpu.memory_space<vmem>>, vector<2x8x32xf32>
    %c0_3 = arith.constant 0 : index
    %4 = memref.load %arg4[%c0_3] : memref<1xf32, #tpu.memory_space<smem>>
    %c0_4 = arith.constant 0 : index
    %c0_5 = arith.constant 0 : index
    %5 = vector.load %arg3[%c0_4, %c0_5] : memref<1x32xf32, #tpu.memory_space<vmem>>, vector<1x32xf32>
    %6 = vector.shape_cast %5 : vector<1x32xf32> to vector<1x1x32xf32>
    %7 = vector.broadcast %6 : vector<1x1x32xf32> to vector<2x8x32xf32>
    %8 = arith.mulf %3, %7 : vector<2x8x32xf32>
    %cst = arith.constant dense<0.000000e+00> : vector<2x8xf32>
    %9 = vector.multi_reduction <add>, %8, %cst [2] : vector<2x8x32xf32> to vector<2x8xf32>
    %10 = vector.shape_cast %9 : vector<2x8xf32> to vector<2x8x1xf32>
    %11 = vector.broadcast %4 : f32 to vector<2x8x1xf32>
    %12 = arith.addf %10, %11 : vector<2x8x1xf32>
    %13 = math.tanh %12 : vector<2x8x1xf32>
    %14 = math.exp %13 : vector<2x8x1xf32>
    %15 = vector.broadcast %14 : vector<2x8x1xf32> to vector<2x8x32xf32>
    %16 = arith.mulf %3, %15 : vector<2x8x32xf32>
    %c0_6 = arith.constant 0 : index
    %c0_7 = arith.constant 0 : index
    %17 = vector.load %arg6[%c0_6, %c0_7] : memref<2x32xf32, #tpu.memory_space<vmem>>, vector<2x32xf32>
    %cst_8 = arith.constant dense<0.000000e+00> : vector<2x32xf32>
    %18 = vector.multi_reduction <add>, %16, %cst_8 [1] : vector<2x8x32xf32> to vector<2x32xf32>
    %19 = arith.addf %17, %18 : vector<2x32xf32>
    %c0_9 = arith.constant 0 : index
    %c0_10 = arith.constant 0 : index
    %20 = vector.load %arg6[%c0_9, %c0_10] : memref<2x32xf32, #tpu.memory_space<vmem>>, vector<2x32xf32>
    tpu.vector_store %arg6[%c0_9, %c0_10], %19 {strides = array<i32>} : memref<2x32xf32, #tpu.memory_space<vmem>>, vector<2x32xf32>,
    %c0_11 = arith.constant 0 : index
    %c0_12 = arith.constant 0 : index
    %21 = vector.load %arg7[%c0_11, %c0_12] : memref<2x1xf32, #tpu.memory_space<vmem>>, vector<2x1xf32>
    %cst_13 = arith.constant dense<0.000000e+00> : vector<2x1xf32>
    %22 = vector.multi_reduction <add>, %14, %cst_13 [1] : vector<2x8x1xf32> to vector<2x1xf32>
    %23 = arith.addf %21, %22 : vector<2x1xf32>
    %c0_14 = arith.constant 0 : index
    %c0_15 = arith.constant 0 : index
    %24 = vector.load %arg7[%c0_14, %c0_15] : memref<2x1xf32, #tpu.memory_space<vmem>>, vector<2x1xf32>
    tpu.vector_store %arg7[%c0_14, %c0_15], %23 {strides = array<i32>} : memref<2x1xf32, #tpu.memory_space<vmem>>, vector<2x1xf32>,
    %c0_i32_16 = arith.constant 0 : i32
    %25 = arith.cmpi eq, %arg1, %c0_i32_16 : i32
    %26 = arith.extui %25 : i1 to i32
    %c0_i32_17 = arith.constant 0 : i32
    %27 = arith.cmpi ne, %26, %c0_i32_17 : i32
    scf.if %27 {
      %c0_18 = arith.constant 0 : index
      %c0_19 = arith.constant 0 : index
      %28 = vector.load %arg6[%c0_18, %c0_19] : memref<2x32xf32, #tpu.memory_space<vmem>>, vector<2x32xf32>
      %c0_20 = arith.constant 0 : index
      %c0_21 = arith.constant 0 : index
      %29 = vector.load %arg7[%c0_20, %c0_21] : memref<2x1xf32, #tpu.memory_space<vmem>>, vector<2x1xf32>
      %cst_22 = arith.constant 1.000000e-10 : f32
      %30 = vector.broadcast %cst_22 : f32 to vector<2x1xf32>
      %31 = arith.addf %29, %30 : vector<2x1xf32>
      %32 = vector.broadcast %31 : vector<2x1xf32> to vector<2x32xf32>
      %33 = arith.divf %28, %32 : vector<2x32xf32>
      %c0_23 = arith.constant 0 : index
      %c0_24 = arith.constant 0 : index
      %34 = vector.load %arg5[%c0_23, %c0_24] : memref<2x32xf32, #tpu.memory_space<vmem>>, vector<2x32xf32>
      tpu.vector_store %arg5[%c0_23, %c0_24], %33 {strides = array<i32>} : memref<2x32xf32, #tpu.memory_space<vmem>>, vector<2x32xf32>,
    } else {
    }
    return
  }
  func.func @transform_0(%arg0: i32, %arg1: i32) -> (i32, i32, i32) {
    %c0_i32 = arith.constant 0 : i32
    %c0_i32_0 = arith.constant 0 : i32
    return %arg0, %arg1, %c0_i32 : i32, i32, i32
  }
  func.func @transform_1(%arg0: i32, %arg1: i32) -> (i32, i32) {
    %c0_i32 = arith.constant 0 : i32
    %c0_i32_0 = arith.constant 0 : i32
    %c0_i32_1 = arith.constant 0 : i32
    return %c0_i32, %c0_i32_0 : i32, i32
  }
  func.func @transform_2(%arg0: i32, %arg1: i32) -> i32 {
    %c0_i32 = arith.constant 0 : i32
    %c0_i32_0 = arith.constant 0 : i32
    return %c0_i32 : i32
  }
  func.func @transform_3(%arg0: i32, %arg1: i32) -> (i32, i32) {
    %c0_i32 = arith.constant 0 : i32
    %c0_i32_0 = arith.constant 0 : i32
    return %arg0, %c0_i32 : i32, i32
  }
}

</mosaic_0001>

<bundles_post_ra>
// kernel: tpu_custom_call.1
= control target key start
LH: loop header
LB: loop body
LE: loop exit
PB: predicated region body
PF: predicated region fallthrough
CT: control target
= control target key end

     0   :  { %9 = vsyncpa [#allocation6], 0  ;;  %s272_s0 = inlined_call_operand.hbm [shape: f32[2,8,32], index: 0, kind: input, shape index: {}]   ;;  %s273_s1 = inlined_call_operand.vmem [shape: f32[1,32], index: 1, kind: input, shape index: {}]   ;;  %s274_s2 = inlined_call_operand.<no memory space> [shape: f32[1], index: 2, kind: input, shape index: {}]   ;;  %s275_s3 = inlined_call_operand.hbm [shape: f32[2,32], index: 3, kind: output, shape index: {}]  }
   0x1   :  { %10 = vsyncpa [#allocation7], 0  ;;  %s207_s12 = smov [#allocation5]   ;;  %s159_s16 = scalar_lea.hbm %s272_s0, 256 }
   0x2   :  { %s16_s13 = sshll.u32 %s207_s12, 4  ;;  %p160_p0 = scmp.ne.s32.totalorder %s272_s0, %s159_s16  ;;  %s17_s13 = int_to_ptr.vmem [resolvable:$true] %s16_s13 }
   0x3   :  { %p163_p1 = scmp.lt.u32.totalorder %s159_s16, %s272_s0 }
   0x5   :  { %p165_p2 = pnand %p163_p1, %p160_p0 }
   0x7   :  { %168 = shalt.err (!%p165_p2)
}
   0x8   :  { %s169_s21 = scalar_lea.vmem %s17_s13, 256  ;;  %p174_p4 = scmp.lt.s32.totalorder %s17_s13, %s17_s13 }
   0x9   :  { %p170_p3 = scmp.ne.s32.totalorder %s17_s13, %s169_s21  ;;  %p175_p5 = scmp.lt.s32.totalorder %s169_s21, %s169_s21 }
   0xb   :  { %p176_p6 = por %p175_p5, %p174_p4 }
   0xd   :  { %p177_p7 = pnand %p176_p6, %p170_p3 }
   0xf   :  { %180 = shalt.err (!%p177_p7)
}
  0x10   :  { %s208_s22 = smov 128   ;;  %s209_s23 = smov 8  }
  0x11   :  { %22 = dma.hbm_to_vmem [thread:$0]  %s272_s0, 256, %s17_s13, [#allocation6], %s208_s22, %s208_s22, %s209_s23  }
  0x12   :  { %203 = dma.done.wait [#allocation6], 256  }
  0x13   :  { %204 = vsyncadd [#allocation6], 4294967040  ;;  %vm36_vm0 = vcmask 1024   ;;  %v210_v0 = vmov 0.0   ;;  %v38_v1 = vld [vmem:[#allocation5] sm:$0xff]  ;;  %vm50_vm1 = vcmask 261120   ;;  %v57_v9 = vstv %s274_s2 }
  0x14   :  { %37 = vst.msk [vmem:[#allocation3] sm:$0x3] %vm36_vm0, %v210_v0  ;;  %v140_v2 = vld [vmem:[%s273_s1] ss:$0 sm:$0xff]  ;;  %v39_v3 = vld [vmem:[#allocation5 + $0x8] sm:$0xff]  ;;  %vm34_vm2 = vcmask 254976  }
  0x15   :  { %v48_v4 = vmul.f32 %v140_v2, %v38_v1  ;;  %v49_v5 = vmul.f32 %v140_v2, %v39_v3  ;;  %35 = vst.msk [vmem:[#allocation2] sm:$0x3] %vm34_vm2, %v210_v0  ;;  %v211_v8 = vmov 0   ;;  %vm85_vm3 = vcmask 1041409   ;;  %s212_s1 = smov [#allocation8]  }
  0x16   :  { %147 = vset.pattern.permute.xlu1 %v211_v8  ;;  %148 = vset.pattern.permute.xlu0 %v211_v8  ;;  %s131_s2 = sshll.u32 %s212_s1, 4  ;;  %s132_s2 = int_to_ptr.vmem [resolvable:$true] %s131_s2 }
  0x17   :  { %v51_v6 = vsel %vm50_vm1, %v48_v4, 0.0  ;;  %v54_v7 = vsel %vm50_vm1, %v49_v5, 0.0  ;;  %s181_s29 = scalar_lea.vmem %s132_s2, 32  ;;  %p186_p9 = scmp.lt.s32.totalorder %s132_s2, %s132_s2 }
  0x18   :  { %52 = vadd.xlane.f32.xlu0 %v51_v6  ;;  %p182_p8 = scmp.ne.s32.totalorder %s132_s2, %s181_s29  ;;  %p187_p10 = scmp.lt.s32.totalorder %s181_s29, %s181_s29 }
  0x1a   :  { %p188_p11 = por %p187_p10, %p186_p9 }
  0x1b   :  { %v91_v44 = vld [vmem:[#allocation3] sm:$0x3] }
  0x1c   :  { %55 = vadd.xlane.f32.xlu0 %v54_v7  ;;  %v68_v49 = vld [vmem:[#allocation2] sm:$0x3]  ;;  %p189_p12 = pnand %p188_p11, %p182_p8 }
  0xa5   :  { %v53_v10 = vpop.xlane.xlu0 %52 }
  0xa6   :  { %v58_v11 = vadd.f32 %v57_v9, %v53_v10 }
  0xa8   :  { %149 = vtanh.f32 %v58_v11 }
  0xa9   :  { %v56_v12 = vpop.xlane.xlu0 %55 }
  0xaa   :  { %v59_v13 = vadd.f32 %v57_v9, %v56_v12 }
  0xac   :  { %151 = vtanh.f32 %v59_v13 }
  0xb2   :  { %v150_v14 = vpop.eup %149 }
  0xb3   :  { %v62_v15 = vmul.f32 1.442695, %v150_v14 }
  0xb5   :  { %153 = vpow2.f32 %v62_v15 }
  0xb6   :  { %v152_v16 = vpop.eup %151 }
  0xb7   :  { %v64_v17 = vmul.f32 1.442695, %v152_v16 }
  0xb9   :  { %155 = vpow2.f32 %v64_v17 }
  0xbf   :  { %v154_v18 = vpop.eup %153 }
  0xc0   :  { %v66_v19 = vmul.f32 %v154_v18, %v38_v1  ;;  %v92_v20 = vrot.slane %v154_v18, 4 }
  0xc2   :  { %v93_v21 = vadd.f32 %v154_v18, %v92_v20  ;;  %v69_v22 = vsel %vm50_vm1, %v66_v19, 0.0 }
  0xc3   :  { %v156_v23 = vpop.eup %155  ;;  %v70_v24 = vrot.slane %v69_v22, 4 }
  0xc4   :  { %v94_v25 = vrot.slane %v93_v21, 2  ;;  %v67_v26 = vmul.f32 %v156_v23, %v39_v3  ;;  %v98_v27 = vrot.slane %v156_v23, 4 }
  0xc5   :  { %v71_v28 = vadd.f32 %v70_v24, %v69_v22 }
  0xc6   :  { %v95_v29 = vadd.f32 %v94_v25, %v93_v21  ;;  %v99_v30 = vadd.f32 %v156_v23, %v98_v27  ;;  %v76_v31 = vsel %vm50_vm1, %v67_v26, 0.0 }
  0xc7   :  { %v72_v32 = vrot.slane %v71_v28, 2  ;;  %v77_v33 = vrot.slane %v76_v31, 4 }
  0xc8   :  { %v100_v34 = vrot.slane %v99_v30, 2  ;;  %v96_v37 = vrot.slane %v95_v29, 1 }
  0xc9   :  { %v73_v35 = vadd.f32 %v72_v32, %v71_v28  ;;  %v78_v36 = vadd.f32 %v77_v33, %v76_v31 }
  0xca   :  { %v101_v38 = vadd.f32 %v100_v34, %v99_v30  ;;  %v97_v43 = vadd.f32 %v96_v37, %v95_v29 }
  0xcb   :  { %v79_v39 = vrot.slane %v78_v36, 2  ;;  %v74_v41 = vrot.slane %v73_v35, 1 }
  0xcc   :  { %v102_v40 = vrot.slane %v101_v38, 1 }
  0xcd   :  { %v80_v42 = vadd.f32 %v79_v39, %v78_v36  ;;  %v75_v50 = vadd.f32 %v74_v41, %v73_v35 }
  0xce   :  { %v103_v45 = vadd.f32 %v102_v40, %v101_v38 }
  0xcf   :  { %v81_v46 = vrot.slane %v80_v42, 1 }
  0xd0   :  { %v106_v47 = vsel %vm85_vm3, %v103_v45, %v97_v43 }
  0xd1   :  { %v108_v48 = vadd.f32 %v106_v47, %v91_v44  ;;  %v82_v51 = vadd.f32 %v81_v46, %v80_v42 }
  0xd3   :  { %110 = vst.msk [vmem:[#allocation3] sm:$0x3] %vm36_vm0, %v108_v48  ;;  %v86_v52 = vsel %vm85_vm3, %v82_v51, %v75_v50 }
  0xd4   :  { %v88_v53 = vadd.f32 %v86_v52, %v68_v49 }
  0xd6   :  { %90 = vst.msk [vmem:[#allocation2] sm:$0x3] %vm34_vm2, %v88_v53 }
  0xda   :  { %v115_v54 = vld [vmem:[#allocation3] sm:$0x3] }
  0xdb   :  { %v116_v55 = vadd.f32 1e-10, %v115_v54 }
  0xdd   :  { %119 = vperm.xlu1 %147, %v116_v55   ;;  %v114_v58 = vld [vmem:[#allocation2] sm:$0x3] }
 0x15c   :  { %v120_v56 = vpop.permute.xlu1 %119 }
 0x15d   :  { %157 = vrcp.f32 %v120_v56 }
 0x167   :  { %v158_v57 = vpop.eup %157 }
 0x168   :  { %v123_v59 = vmul.f32 %v158_v57, %v114_v58 }
 0x16a   :  { %124 = vst.msk [vmem:[#allocation8] sm:$0x3] %vm34_vm2, %v123_v59 }
 0x16b   :  { %192 = shalt.err (!%p189_p12)
}
 0x16c   :  { %s193_s5 = scalar_lea.hbm %s275_s3, 32 }
 0x16d   :  { %p194_p13 = scmp.ne.s32.totalorder %s275_s3, %s193_s5  ;;  %p197_p0 = scmp.lt.u32.totalorder %s193_s5, %s275_s3 }
 0x16f   :  { %p199_p1 = pnand %p197_p0, %p194_p13 }
 0x171   :  { %202 = shalt.err (!%p199_p1)
}
 0x172   :  { %134 = dma.vmem_to_hbm [thread:$0]  %s132_s2, 32, %s275_s3, [#allocation7]  }
 0x173   :  { %205 = dma.done.wait [#allocation7], 32  }
 0x174   :  { %206 = vsyncadd [#allocation7], 4294967264 }
 0x175   :  { %138 = vsyncpa [#allocation6], 1 }
 0x176   :  { %139 = vsyncpa [#allocation7], 1 }

</bundles_post_ra>
